<compile_context>
chip_gen: v7x
topology: tpu7x:2x2x1
jax: 0.10.0
libtpu: 0.0.40
codegen_flags: <defaults>
</compile_context>

<pallas_src>
import jax
import jax.numpy as jnp
from jax.experimental import pallas as pl
from jax.experimental.pallas import tpu as pltpu


# ---------------------------------------------------------------------------
# Kernels
# ---------------------------------------------------------------------------
def lstm_cell_kernel(h_ref, cs_ref, x_ref, c_ref, w_ref, b_ref, hy_ref, cy_ref):
    """Single fused LSTM cell step (exact module.forward equivalent)."""
    H = hy_ref.shape[1]
    cdt = w_ref.dtype  # matmul operand dtype (bf16)

    # [h, cell_state, x]: every segment starts at a 128-aligned lane offset.
    xin = jnp.concatenate(
        [h_ref[...].astype(cdt), cs_ref[...].astype(cdt), x_ref[...].astype(cdt)],
        axis=1,
    )

    # One MXU matmul instead of three; f32 accumulation.
    gates = jnp.dot(xin, w_ref[...], preferred_element_type=jnp.float32)
    gates = gates + b_ref[...]  # [1, 4H] broadcast over batch, f32

    # Columns were permuted at prep time to [i | f | o | g].
    sig = jax.nn.sigmoid(gates[:, : 3 * H])
    ingate = sig[:, 0:H]
    forgetgate = sig[:, H:2 * H]
    outgate = sig[:, 2 * H:3 * H]
    cellgate = jnp.tanh(gates[:, 3 * H:])

    cy = forgetgate * c_ref[...] + ingate * cellgate   # f32
    hy = outgate * jnp.tanh(cy)

    hy_ref[...] = hy.astype(hy_ref.dtype)
    cy_ref[...] = cy.astype(cy_ref.dtype)              # cy stays f32


def lstm_seq_kernel(x_ref, h0_ref, cs0_ref, c0_ref, w_ref, b_ref,
                    hy_ref, cy_ref, xin_sc, c_sc):
    """T-step fused LSTM: grid=(T,), weights VMEM-resident, state in scratch.

    xin_sc : [B, hidden+cell+input] bf16 persistent slab [h | cell_state | x]
    c_sc   : [B, hidden] f32 carried cell state (state[1])
    """
    t = pl.program_id(0)
    H = hy_ref.shape[2]
    C = cs0_ref.shape[1]
    I = x_ref.shape[2]
    cdt = w_ref.dtype

    # First step: load the initial recurrent state into the persistent slab.
    @pl.when(t == 0)
    def _():
        xin_sc[:, 0:H] = h0_ref[...].astype(cdt)
        xin_sc[:, H:H + C] = cs0_ref[...].astype(cdt)
        c_sc[...] = c0_ref[...].astype(jnp.float32)

    # Stream this step's input into its 128-aligned segment of the slab.
    xin_sc[:, H + C:H + C + I] = x_ref[0].astype(cdt)

    gates = jnp.dot(xin_sc[...], w_ref[...], preferred_element_type=jnp.float32)
    gates = gates + b_ref[...]

    sig = jax.nn.sigmoid(gates[:, : 3 * H])
    ingate = sig[:, 0:H]
    forgetgate = sig[:, H:2 * H]
    outgate = sig[:, 2 * H:3 * H]
    cellgate = jnp.tanh(gates[:, 3 * H:])

    cy = forgetgate * c_sc[...] + ingate * cellgate    # f32 recurrence
    hy = outgate * jnp.tanh(cy)

    hy_ref[0] = hy.astype(hy_ref.dtype)
    cy_ref[0] = cy.astype(cy_ref.dtype)

    # Carry state for step t+1 (module: cell_state <- cy, state <- (hy, cy)).
    c_sc[...] = cy
    xin_sc[:, 0:H] = hy.astype(cdt)
    xin_sc[:, H:H + C] = cy.astype(cdt)


# ---------------------------------------------------------------------------
# One-time parameter preparation (hoisted out of the hot path)
# ---------------------------------------------------------------------------
def prepare_lstm_params(W, U, V, bias_ih, compute_dtype=jnp.bfloat16):
    """Transpose, stack and gate-permute the LSTM weights once.

    W : [4H, input], U : [4H, hidden], V : [4H, cell], bias_ih : [4H]
    Returns
      W_packed : [hidden+cell+input, 4H] compute_dtype, column order [i|f|o|g]
      b_packed : [1, 4H] f32, same column order

    compute_dtype=bf16 is a deliberate accuracy/bandwidth trade (halves weight
    DMA/VMEM); keep bf16 rather than quantizing further once the fused-sequence
    path makes the weights VMEM-resident.
    """
    H4 = W.shape[0]
    H = H4 // 4
    hidden, cell = U.shape[1], V.shape[1]
    assert U.shape[0] == H4 and V.shape[0] == H4 and bias_ih.shape == (H4,)
    assert hidden == H, "U must be [4*hidden, hidden]"
    assert hidden % 128 == 0 and cell % 128 == 0, (
        "hidden_size and cell_size must be multiples of 128: the packed "
        "[h|cell_state|x] layout and [i|f|o|g] gate slices rely on 128-lane "
        "alignment")

    # Row order [U; V; W] matches the in-kernel layout [h, cell_state, x].
    W_stacked = jnp.concatenate([U, V, W], axis=1).T  # [hidden+cell+input, 4H]

    # torch chunk order [i | f | g | o] -> reorder columns to [i | f | o | g].
    perm = jnp.concatenate([
        jnp.arange(0, 2 * H),          # i, f
        jnp.arange(3 * H, 4 * H),      # o
        jnp.arange(2 * H, 3 * H),      # g
    ])
    W_packed = W_stacked[:, perm].astype(compute_dtype)
    b_packed = bias_ih[perm].reshape(1, H4).astype(jnp.float32)
    return W_packed, b_packed


# ---------------------------------------------------------------------------
# pallas_call builders + robust invocation helper
# ---------------------------------------------------------------------------
def _first_working(builders, *args):
    """Run the first builder whose pallas_call compiles and executes cleanly."""
    last_err = None
    for build in builders:
        try:
            out = build()(*args)
            jax.block_until_ready(out)
            return out
        except Exception as err:  # fall back to a plainer build (e.g. no Buffered)
            last_err = err
    raise last_err


def _make_lstm_step_call(B, I, H, C, x_dtype, w_dtype, aliases):
    K = H + C + I
    full = lambda shape: pl.BlockSpec(shape, lambda: (0,) * len(shape))
    wb = jnp.dtype(w_dtype).itemsize
    xb = jnp.dtype(x_dtype).itemsize
    cost = pl.CostEstimate(
        flops=2 * B * K * 4 * H,
        transcendentals=5 * B * H,
        bytes_accessed=int(K * 4 * H * wb + 4 * H * 4
                           + B * (2 * H + C) * 4 + B * I * xb + B * H * (xb + 4)),
    )
    return pl.pallas_call(
        lstm_cell_kernel,
        out_shape=(jax.ShapeDtypeStruct((B, H), x_dtype),       # hy
                   jax.ShapeDtypeStruct((B, H), jnp.float32)),  # cy pinned to f32
        grid=(),
        in_specs=[full((B, H)),       # h_prev
                  full((B, C)),       # cell_state
                  full((B, I)),       # x
                  full((B, H)),       # c_prev
                  full((K, 4 * H)),   # W_packed
                  full((1, 4 * H))],  # b_packed
        out_specs=(full((B, H)), full((B, H))),
        input_output_aliases=dict(aliases),
        cost_estimate=cost,
    )


def _make_lstm_seq_call(T, B, I, H, C, x_dtype, w_dtype, x_buffers):
    K = H + C + I
    resident = lambda shape: pl.BlockSpec(shape, lambda t: (0,) * len(shape))
    if x_buffers is None:
        x_spec = pl.BlockSpec((1, B, I), lambda t: (t, 0, 0))
    else:
        # Deeper buffering: per-step compute is tiny, so hide the x DMA latency.
        x_spec = pl.BlockSpec((1, B, I), lambda t: (t, 0, 0),
                              pipeline_mode=pl.Buffered(x_buffers))
    wb = jnp.dtype(w_dtype).itemsize
    xb = jnp.dtype(x_dtype).itemsize
    cost = pl.CostEstimate(
        flops=2 * T * B * K * 4 * H,
        transcendentals=5 * T * B * H,
        bytes_accessed=int(K * 4 * H * wb + 4 * H * 4 + 3 * B * H * 4
                           + T * B * I * xb + T * B * H * (xb + 4)),
    )
    grid_spec = pltpu.PrefetchScalarGridSpec(
        num_scalar_prefetch=0,
        grid=(T,),
        in_specs=[x_spec,               # x_t, streamed per step
                  resident((B, H)),     # h0          (resident, read at t==0)
                  resident((B, C)),     # cell_state0 (resident, read at t==0)
                  resident((B, H)),     # c0          (resident, read at t==0)
                  resident((K, 4 * H)),  # W_packed: DMA'd once, VMEM-resident
                  resident((1, 4 * H))],  # b_packed
        out_specs=[pl.BlockSpec((1, B, H), lambda t: (t, 0, 0)),   # hy per step
                   pl.BlockSpec((1, B, H), lambda t: (t, 0, 0))],  # cy per step
        scratch_shapes=[pltpu.VMEM((B, K), w_dtype),       # [h|cs|x] bf16 slab
                        pltpu.VMEM((B, H), jnp.float32)],  # carried cell state
    )
    return pl.pallas_call(
        lstm_seq_kernel,
        grid_spec=grid_spec,
        out_shape=(jax.ShapeDtypeStruct((T, B, H), x_dtype),
                   jax.ShapeDtypeStruct((T, B, H), jnp.float32)),
        compiler_params=pltpu.CompilerParams(
            dimension_semantics=("arbitrary",)),  # sequential recurrence over T
        cost_estimate=cost,
    )


# ---------------------------------------------------------------------------
# Public wrappers
# ---------------------------------------------------------------------------
def lstm_cell_forward(x, h_prev, c_prev, cell_state, W_packed, b_packed):
    """Single step (module.forward). Returns (hy, cy); cy is the new cell_state."""
    B, I = x.shape
    K, H4 = W_packed.shape
    H = H4 // 4
    C = cell_state.shape[1]
    assert K == H + C + I

    aliases = {}
    if h_prev.dtype == x.dtype and h_prev.shape == (B, H):
        aliases[0] = 0   # reuse h_prev's buffer for hy
    if c_prev.dtype == jnp.float32 and c_prev.shape == (B, H):
        aliases[3] = 1   # reuse c_prev's buffer for cy
    builders = [
        lambda: _make_lstm_step_call(B, I, H, C, x.dtype, W_packed.dtype, aliases),
        lambda: _make_lstm_step_call(B, I, H, C, x.dtype, W_packed.dtype, {}),
    ]
    return _first_working(builders, h_prev, cell_state, x, c_prev, W_packed, b_packed)


def lstm_cell_sequence(x_seq, h0, c0, cell_state0, W_packed, b_packed):
    """Fused T-step LSTM (the recommended hot path for sequences).

    x_seq: [T, B, input]. Returns (hy_seq [T,B,H] in x.dtype, cy_seq [T,B,H] f32).
    Equivalent to calling the module once per step while carrying
    state = (hy, cy) and cell_state = cy forward.
    """
    T, B, I = x_seq.shape
    K, H4 = W_packed.shape
    H = H4 // 4
    C = cell_state0.shape[1]
    assert K == H + C + I
    assert C == H, ("fused sequence requires cell_size == hidden_size "
                    "(the module reassigns cell_state = cy)")
    # TODO(synk): for multiple independent sequences on v7x, add a leading
    # "parallel" grid axis (or vmap) so both TensorCores are used.
    builders = [
        lambda: _make_lstm_seq_call(T, B, I, H, C, x_seq.dtype, W_packed.dtype, 3),
        lambda: _make_lstm_seq_call(T, B, I, H, C, x_seq.dtype, W_packed.dtype, None),
    ]
    return _first_working(builders, x_seq, h0, cell_state0, c0, W_packed, b_packed)


# ---------------------------------------------------------------------------
# Pure-JAX references
# ---------------------------------------------------------------------------
def _reference(x, h_prev, c_prev, cell_state, W, U, V, bias_ih,
               compute_dtype=jnp.float32):
    cd = compute_dtype
    gates = (
        jnp.dot(x.astype(cd), W.T.astype(cd), preferred_element_type=jnp.float32)
        + jnp.dot(h_prev.astype(cd), U.T.astype(cd), preferred_element_type=jnp.float32)
        + jnp.dot(cell_state.astype(cd), V.T.astype(cd), preferred_element_type=jnp.float32)
        + bias_ih
    )
    H = W.shape[0] // 4
    i = jax.nn.sigmoid(gates[:, 0 * H:1 * H])
    f = jax.nn.sigmoid(gates[:, 1 * H:2 * H])
    g = jnp.tanh(gates[:, 2 * H:3 * H])
    o = jax.nn.sigmoid(gates[:, 3 * H:4 * H])
    cy = f * c_prev + i * g
    hy = o * jnp.tanh(cy)
    return hy, cy


def _reference_sequence(x_seq, h0, c0, cs0, W, U, V, bias_ih,
                        compute_dtype=jnp.float32):
    def step(carry, x_t):
        h, c, cs = carry
        hy, cy = _reference(x_t, h, c, cs, W, U, V, bias_ih, compute_dtype)
        return (hy, cy, cy), (hy, cy)     # state <- (hy, cy); cell_state <- cy
    _, (hy_seq, cy_seq) = jax.lax.scan(step, (h0, c0, cs0), x_seq)
    return hy_seq, cy_seq


if __name__ == "__main__":
    B = 8                 # params.BATCH_SIZE
    input_size = 64
    hidden_size = 128     # multiples of 128 (lane-aligned gate slices)
    cell_size = 128
    T = 16

    key = jax.random.PRNGKey(0)
    k = jax.random.split(key, 7)

    W = jax.random.normal(k[0], (4 * hidden_size, input_size), jnp.float32)
    U = jax.random.normal(k[1], (4 * hidden_size, hidden_size), jnp.float32)
    V = jax.random.normal(k[2], (4 * hidden_size, cell_size), jnp.float32)
    bias_ih = jax.random.normal(k[3], (4 * hidden_size,), jnp.float32)
    cell_state = jnp.zeros((B, cell_size), jnp.float32)

    x = jax.random.normal(k[4], (B, input_size), jnp.float32)
    h0 = jax.random.normal(k[5], (B, hidden_size), jnp.float32)
    c0 = jax.random.normal(k[6], (B, hidden_size), jnp.float32)

    # One-time weight packing (NOT part of the per-step hot path).
    W_packed, b_packed = prepare_lstm_params(W, U, V, bias_ih)
    jax.block_until_ready((W_packed, b_packed))

    # ---------------- single step (exact module.forward) ----------------
    hy_bf, cy_bf = _reference(x, h0, c0, cell_state, W, U, V, bias_ih, jnp.bfloat16)
    hy_f32, cy_f32 = _reference(x, h0, c0, cell_state, W, U, V, bias_ih, jnp.float32)

    hy, cy = lstm_cell_forward(x, h0, c0, cell_state, W_packed, b_packed)
    jax.block_until_ready((hy, cy))

    assert hy.dtype == x.dtype and cy.dtype == jnp.float32
    assert jnp.allclose(hy, hy_bf, atol=2e-3, rtol=2e-3), "hy mismatch (bf16 ref)"
    assert jnp.allclose(cy, cy_bf, atol=2e-3, rtol=2e-3), "cy mismatch (bf16 ref)"
    assert jnp.allclose(hy, hy_f32, atol=0.25), "hy mismatch (f32 ref)"
    assert jnp.allclose(cy, cy_f32, atol=0.25), "cy mismatch (f32 ref)"

    # ---------------- fused T-step sequence (perf-critical path) ----------------
    # Scaled weights keep gate pre-activations O(1) so both references remain
    # numerically comparable over 16 recurrent steps.
    s = jnp.float32(0.05)
    Ws, Us, Vs, bs = W * s, U * s, V * s, bias_ih * s
    Wp_s, bp_s = prepare_lstm_params(Ws, Us, Vs, bs)
    x_seq = jax.random.normal(jax.random.PRNGKey(1), (T, B, input_size), jnp.float32)

    hy_sbf, cy_sbf = _reference_sequence(x_seq, h0, c0, cell_state,
                                         Ws, Us, Vs, bs, jnp.bfloat16)
    hy_sf, cy_sf = _reference_sequence(x_seq, h0, c0, cell_state,
                                       Ws, Us, Vs, bs, jnp.float32)

    hy_seq, cy_seq = lstm_cell_sequence(x_seq, h0, c0, cell_state, Wp_s, bp_s)
    jax.block_until_ready((hy_seq, cy_seq))

    assert hy_seq.shape == (T, B, hidden_size) and cy_seq.dtype == jnp.float32
    assert jnp.allclose(hy_seq, hy_sbf, atol=1e-2, rtol=1e-2), "hy_seq mismatch (bf16 ref)"
    assert jnp.allclose(cy_seq, cy_sbf, atol=1e-2, rtol=1e-2), "cy_seq mismatch (bf16 ref)"
    assert jnp.allclose(hy_seq, hy_sf, atol=0.1), "hy_seq mismatch (f32 ref)"
    assert jnp.allclose(cy_seq, cy_sf, atol=0.1), "cy_seq mismatch (f32 ref)"

    print("KERNEL_OK")
</pallas_src>

<mosaic_0001>
module attributes {stable_mosaic.version = 11 : i64} {
  func.func @lstm_cell_kernel(%arg0: memref<8x128xf32, #tpu.memory_space<vmem>>, %arg1: memref<8x128xf32, #tpu.memory_space<vmem>>, %arg2: memref<8x64xf32, #tpu.memory_space<vmem>>, %arg3: memref<8x128xf32, #tpu.memory_space<vmem>>, %arg4: memref<320x512xbf16, #tpu.memory_space<vmem>>, %arg5: memref<1x512xf32, #tpu.memory_space<vmem>>, %arg6: memref<8x128xf32, #tpu.memory_space<vmem>>, %arg7: memref<8x128xf32, #tpu.memory_space<vmem>>) attributes {dimension_semantics = [], scalar_prefetch = 0 : i64, scratch_operands = 0 : i64, tpu.core_type = #tpu.core_type<tc>} {
    %c0 = arith.constant 0 : index
    %c0_0 = arith.constant 0 : index
    %0 = vector.load %arg0[%c0, %c0_0] : memref<8x128xf32, #tpu.memory_space<vmem>>, vector<8x128xf32>
    %1 = arith.truncf %0 : vector<8x128xf32> to vector<8x128xbf16>
    %c0_1 = arith.constant 0 : index
    %c0_2 = arith.constant 0 : index
    %2 = vector.load %arg1[%c0_1, %c0_2] : memref<8x128xf32, #tpu.memory_space<vmem>>, vector<8x128xf32>
    %3 = arith.truncf %2 : vector<8x128xf32> to vector<8x128xbf16>
    %c0_3 = arith.constant 0 : index
    %c0_4 = arith.constant 0 : index
    %4 = vector.load %arg2[%c0_3, %c0_4] : memref<8x64xf32, #tpu.memory_space<vmem>>, vector<8x64xf32>
    %5 = arith.truncf %4 : vector<8x64xf32> to vector<8x64xbf16>
    %6 = tpu.concatenate %1, %3, %5 in 1 : vector<8x128xbf16>, vector<8x128xbf16>, vector<8x64xbf16> -> vector<8x320xbf16>
    %c0_5 = arith.constant 0 : index
    %c0_6 = arith.constant 0 : index
    %7 = vector.load %arg4[%c0_5, %c0_6] : memref<320x512xbf16, #tpu.memory_space<vmem>>, vector<320x512xbf16>
    %cst = arith.constant dense<0.000000e+00> : vector<8x512xf32>
    %8 = tpu.matmul %6, %7, %cst {dimension_numbers = #tpu.dot_dimension_numbers<[1], [0], [0], [1], [0, 0, 1, 1], [], []>} : vector<8x320xbf16>, vector<320x512xbf16>, vector<8x512xf32> -> vector<8x512xf32>
    %c0_7 = arith.constant 0 : index
    %c0_8 = arith.constant 0 : index
    %9 = vector.load %arg5[%c0_7, %c0_8] : memref<1x512xf32, #tpu.memory_space<vmem>>, vector<1x512xf32>
    %10 = vector.broadcast %9 : vector<1x512xf32> to vector<8x512xf32>
    %11 = arith.addf %8, %10 : vector<8x512xf32>
    %12 = vector.extract_strided_slice %11 {offsets = [0, 0], sizes = [8, 384], strides = [1, 1]} : vector<8x512xf32> to vector<8x384xf32>
    %13 = arith.negf %12 : vector<8x384xf32>
    %14 = math.exp %13 : vector<8x384xf32>
    %cst_9 = arith.constant 1.000000e+00 : f32
    %15 = vector.broadcast %cst_9 : f32 to vector<8x384xf32>
    %16 = arith.addf %15, %14 : vector<8x384xf32>
    %17 = arith.divf %15, %16 : vector<8x384xf32>
    %18 = vector.extract_strided_slice %17 {offsets = [0, 0], sizes = [8, 128], strides = [1, 1]} : vector<8x384xf32> to vector<8x128xf32>
    %19 = vector.extract_strided_slice %17 {offsets = [0, 128], sizes = [8, 128], strides = [1, 1]} : vector<8x384xf32> to vector<8x128xf32>
    %20 = vector.extract_strided_slice %17 {offsets = [0, 256], sizes = [8, 128], strides = [1, 1]} : vector<8x384xf32> to vector<8x128xf32>
    %21 = vector.extract_strided_slice %11 {offsets = [0, 384], sizes = [8, 128], strides = [1, 1]} : vector<8x512xf32> to vector<8x128xf32>
    %22 = math.tanh %21 : vector<8x128xf32>
    %c0_10 = arith.constant 0 : index
    %c0_11 = arith.constant 0 : index
    %23 = vector.load %arg3[%c0_10, %c0_11] : memref<8x128xf32, #tpu.memory_space<vmem>>, vector<8x128xf32>
    %24 = arith.mulf %19, %23 : vector<8x128xf32>
    %25 = arith.mulf %18, %22 : vector<8x128xf32>
    %26 = arith.addf %24, %25 : vector<8x128xf32>
    %27 = math.tanh %26 : vector<8x128xf32>
    %28 = arith.mulf %20, %27 : vector<8x128xf32>
    %c0_12 = arith.constant 0 : index
    %c0_13 = arith.constant 0 : index
    %29 = vector.load %arg6[%c0_12, %c0_13] : memref<8x128xf32, #tpu.memory_space<vmem>>, vector<8x128xf32>
    tpu.vector_store %arg6[%c0_12, %c0_13], %28 {strides = array<i32>} : memref<8x128xf32, #tpu.memory_space<vmem>>, vector<8x128xf32>,
    %c0_14 = arith.constant 0 : index
    %c0_15 = arith.constant 0 : index
    %30 = vector.load %arg7[%c0_14, %c0_15] : memref<8x128xf32, #tpu.memory_space<vmem>>, vector<8x128xf32>
    tpu.vector_store %arg7[%c0_14, %c0_15], %26 {strides = array<i32>} : memref<8x128xf32, #tpu.memory_space<vmem>>, vector<8x128xf32>,
    return
  }
}

module attributes {stable_mosaic.version = 11 : i64} {
  func.func @lstm_cell_kernel(%arg0: memref<8x128xf32, #tpu.memory_space<vmem>>, %arg1: memref<8x128xf32, #tpu.memory_space<vmem>>, %arg2: memref<8x64xf32, #tpu.memory_space<vmem>>, %arg3: memref<8x128xf32, #tpu.memory_space<vmem>>, %arg4: memref<320x512xbf16, #tpu.memory_space<vmem>>, %arg5: memref<1x512xf32, #tpu.memory_space<vmem>>, %arg6: memref<8x128xf32, #tpu.memory_space<vmem>>, %arg7: memref<8x128xf32, #tpu.memory_space<vmem>>) attributes {dimension_semantics = [], scalar_prefetch = 0 : i64, scratch_operands = 0 : i64, tpu.core_type = #tpu.core_type<tc>} {
    %c0 = arith.constant 0 : index
    %c0_0 = arith.constant 0 : index
    %0 = vector.load %arg0[%c0, %c0_0] : memref<8x128xf32, #tpu.memory_space<vmem>>, vector<8x128xf32>
    %1 = arith.truncf %0 : vector<8x128xf32> to vector<8x128xbf16>
    %c0_1 = arith.constant 0 : index
    %c0_2 = arith.constant 0 : index
    %2 = vector.load %arg1[%c0_1, %c0_2] : memref<8x128xf32, #tpu.memory_space<vmem>>, vector<8x128xf32>
    %3 = arith.truncf %2 : vector<8x128xf32> to vector<8x128xbf16>
    %c0_3 = arith.constant 0 : index
    %c0_4 = arith.constant 0 : index
    %4 = vector.load %arg2[%c0_3, %c0_4] : memref<8x64xf32, #tpu.memory_space<vmem>>, vector<8x64xf32>
    %5 = arith.truncf %4 : vector<8x64xf32> to vector<8x64xbf16>
    %6 = tpu.concatenate %1, %3, %5 in 1 : vector<8x128xbf16>, vector<8x128xbf16>, vector<8x64xbf16> -> vector<8x320xbf16>
    %c0_5 = arith.constant 0 : index
    %c0_6 = arith.constant 0 : index
    %7 = vector.load %arg4[%c0_5, %c0_6] : memref<320x512xbf16, #tpu.memory_space<vmem>>, vector<320x512xbf16>
    %cst = arith.constant dense<0.000000e+00> : vector<8x512xf32>
    %8 = tpu.matmul %6, %7, %cst {dimension_numbers = #tpu.dot_dimension_numbers<[1], [0], [0], [1], [0, 0, 1, 1], [], []>} : vector<8x320xbf16>, vector<320x512xbf16>, vector<8x512xf32> -> vector<8x512xf32>
    %c0_7 = arith.constant 0 : index
    %c0_8 = arith.constant 0 : index
    %9 = vector.load %arg5[%c0_7, %c0_8] : memref<1x512xf32, #tpu.memory_space<vmem>>, vector<1x512xf32>
    %10 = vector.broadcast %9 : vector<1x512xf32> to vector<8x512xf32>
    %11 = arith.addf %8, %10 : vector<8x512xf32>
    %12 = vector.extract_strided_slice %11 {offsets = [0, 0], sizes = [8, 384], strides = [1, 1]} : vector<8x512xf32> to vector<8x384xf32>
    %13 = arith.negf %12 : vector<8x384xf32>
    %14 = math.exp %13 : vector<8x384xf32>
    %cst_9 = arith.constant 1.000000e+00 : f32
    %15 = vector.broadcast %cst_9 : f32 to vector<8x384xf32>
    %16 = arith.addf %15, %14 : vector<8x384xf32>
    %17 = arith.divf %15, %16 : vector<8x384xf32>
    %18 = vector.extract_strided_slice %17 {offsets = [0, 0], sizes = [8, 128], strides = [1, 1]} : vector<8x384xf32> to vector<8x128xf32>
    %19 = vector.extract_strided_slice %17 {offsets = [0, 128], sizes = [8, 128], strides = [1, 1]} : vector<8x384xf32> to vector<8x128xf32>
    %20 = vector.extract_strided_slice %17 {offsets = [0, 256], sizes = [8, 128], strides = [1, 1]} : vector<8x384xf32> to vector<8x128xf32>
    %21 = vector.extract_strided_slice %11 {offsets = [0, 384], sizes = [8, 128], strides = [1, 1]} : vector<8x512xf32> to vector<8x128xf32>
    %22 = math.tanh %21 : vector<8x128xf32>
    %c0_10 = arith.constant 0 : index
    %c0_11 = arith.constant 0 : index
    %23 = vector.load %arg3[%c0_10, %c0_11] : memref<8x128xf32, #tpu.memory_space<vmem>>, vector<8x128xf32>
    %24 = arith.mulf %19, %23 : vector<8x128xf32>
    %25 = arith.mulf %18, %22 : vector<8x128xf32>
    %26 = arith.addf %24, %25 : vector<8x128xf32>
    %27 = math.tanh %26 : vector<8x128xf32>
    %28 = arith.mulf %20, %27 : vector<8x128xf32>
    %c0_12 = arith.constant 0 : index
    %c0_13 = arith.constant 0 : index
    %29 = vector.load %arg6[%c0_12, %c0_13] : memref<8x128xf32, #tpu.memory_space<vmem>>, vector<8x128xf32>
    tpu.vector_store %arg6[%c0_12, %c0_13], %28 {strides = array<i32>} : memref<8x128xf32, #tpu.memory_space<vmem>>, vector<8x128xf32>,
    %c0_14 = arith.constant 0 : index
    %c0_15 = arith.constant 0 : index
    %30 = vector.load %arg7[%c0_14, %c0_15] : memref<8x128xf32, #tpu.memory_space<vmem>>, vector<8x128xf32>
    tpu.vector_store %arg7[%c0_14, %c0_15], %26 {strides = array<i32>} : memref<8x128xf32, #tpu.memory_space<vmem>>, vector<8x128xf32>,
    return
  }
}

</mosaic_0001>

<bundles_post_ra>
// kernel: tpu_custom_call.1
= control target key start
LH: loop header
LB: loop body
LE: loop exit
PB: predicated region body
PF: predicated region fallthrough
CT: control target
= control target key end

     0   :  { %13 = vsyncpa [#allocation3], 0  ;;  %s1274_s0 = inlined_call_operand.hbm [shape: f32[8,128], index: 0, kind: input, shape index: {}, may-alias: {0,6}]   ;;  %s1275_s1 = inlined_call_operand.vmem [shape: f32[8,128], index: 1, kind: input, shape index: {}]   ;;  %s1276_s2 = inlined_call_operand.vmem [shape: f32[8,64], index: 2, kind: input, shape index: {}]   ;;  %s1277_s3 = inlined_call_operand.hbm [shape: f32[8,128], index: 3, kind: input, shape index: {}, may-alias: {3,7}]   ;;  %s1278_s4 = inlined_call_operand.hbm [shape: bf16[320,512], index: 4, kind: input, shape index: {}]   ;;  %s1279_s5 = inlined_call_operand.vmem [shape: f32[1,512], index: 5, kind: input, shape index: {}]   ;;  %s1280_s6 = inlined_call_operand.hbm [shape: f32[8,128], index: 6, kind: output, shape index: {0}, may-alias: {0,6}]   ;;  %s1281_s7 = inlined_call_operand.hbm [shape: f32[8,128], index: 7, kind: output, shape index: {1}, may-alias: {3,7}]  }
   0x1   :  { %14 = vsyncpa [#allocation6], 0 }
   0x2   :  { %15 = vsyncpa [#allocation4], 0 }
   0x3   :  { %16 = vsyncpa [#allocation10], 0  ;;  %s1157_s24 = smov [#allocation5]   ;;  %s1158_s26 = smov [#allocation2]  }
   0x4   :  { %s37_s25 = sshll.u32 %s1157_s24, 4  ;;  %s23_s27 = sshll.u32 %s1158_s26, 4  ;;  %s38_s25 = int_to_ptr.vmem [resolvable:$true] %s37_s25  ;;  %s24_s27 = int_to_ptr.vmem [resolvable:$true] %s23_s27 }
   0x5   :  { %s1039_s30 = scalar_lea.hbm %s1277_s3, 128 }
   0x6   :  { %p1040_p0 = scmp.ne.s32.totalorder %s1277_s3, %s1039_s30  ;;  %p1043_p1 = scmp.lt.u32.totalorder %s1039_s30, %s1277_s3 }
   0x8   :  { %p1045_p2 = pnand %p1043_p1, %p1040_p0 }
   0xa   :  { %1048 = shalt.err (!%p1045_p2)
}
   0xb   :  { %s1049_s12 = scalar_lea.vmem %s38_s25, 128  ;;  %p1054_p4 = scmp.lt.s32.totalorder %s38_s25, %s38_s25 }
   0xc   :  { %p1050_p3 = scmp.ne.s32.totalorder %s38_s25, %s1049_s12  ;;  %p1055_p5 = scmp.lt.s32.totalorder %s1049_s12, %s1049_s12 }
   0xe   :  { %p1056_p6 = por %p1055_p5, %p1054_p4 }
  0x10   :  { %p1057_p7 = pnand %p1056_p6, %p1050_p3 }
  0x12   :  { %1060 = shalt.err (!%p1057_p7)
}
  0x13   :  { %40 = dma.hbm_to_vmem [thread:$0]  %s1277_s3, 128, %s38_s25, [#allocation6]  }
  0x14   :  { %s1061_s17 = scalar_lea.hbm %s1274_s0, 128 }
  0x15   :  { %p1062_p8 = scmp.ne.s32.totalorder %s1274_s0, %s1061_s17  ;;  %p1065_p9 = scmp.lt.u32.totalorder %s1061_s17, %s1274_s0 }
  0x17   :  { %p1067_p10 = pnand %p1065_p9, %p1062_p8 }
  0x19   :  { %1070 = shalt.err (!%p1067_p10)
}
  0x1a   :  { %s1071_s22 = scalar_lea.vmem %s24_s27, 128  ;;  %p1076_p12 = scmp.lt.s32.totalorder %s24_s27, %s24_s27 }
  0x1b   :  { %p1072_p11 = scmp.ne.s32.totalorder %s24_s27, %s1071_s22  ;;  %p1077_p13 = scmp.lt.s32.totalorder %s1071_s22, %s1071_s22 }
  0x1d   :  { %p1078_p0 = por %p1077_p13, %p1076_p12 }
  0x1f   :  { %p1079_p1 = pnand %p1078_p0, %p1072_p11 }
  0x21   :  { %1082 = shalt.err (!%p1079_p1)
}
  0x22   :  { %26 = dma.hbm_to_vmem [thread:$0]  %s1274_s0, 128, %s24_s27, [#allocation3]  }
  0x23   :  { %s1159_s24 = smov [#allocation7]   ;;  %s1083_s29 = scalar_lea.hbm %s1278_s4, 10240 }
  0x24   :  { %s46_s25 = sshll.u32 %s1159_s24, 4  ;;  %p1084_p2 = scmp.ne.s32.totalorder %s1278_s4, %s1083_s29  ;;  %s47_s25 = int_to_ptr.vmem [resolvable:$true] %s46_s25 }
  0x25   :  { %p1087_p3 = scmp.lt.u32.totalorder %s1083_s29, %s1278_s4 }
  0x27   :  { %p1089_p4 = pnand %p1087_p3, %p1084_p2 }
  0x29   :  { %1092 = shalt.err (!%p1089_p4)
}
  0x2a   :  { %s1093_s11 = scalar_lea.vmem %s47_s25, 10240  ;;  %p1098_p6 = scmp.lt.s32.totalorder %s47_s25, %s47_s25 }
  0x2b   :  { %p1094_p5 = scmp.ne.s32.totalorder %s47_s25, %s1093_s11  ;;  %p1099_p7 = scmp.lt.s32.totalorder %s1093_s11, %s1093_s11 }
  0x2d   :  { %p1100_p8 = por %p1099_p7, %p1098_p6 }
  0x2f   :  { %p1101_p9 = pnand %p1100_p8, %p1094_p5 }
  0x31   :  { %1104 = shalt.err (!%p1101_p9)
}
  0x32   :  { %s1160_s0 = smov 256   ;;  %s1161_s27 = smov 16  }
  0x33   :  { %52 = dma.hbm_to_vmem [thread:$0]  %s1278_s4, 10240, %s47_s25, [#allocation6], %s1160_s0, %s1160_s0, %s1161_s27  }
  0x34   :  { %1149 = dma.done.wait [#allocation3], 128  }
  0x35   :  { %1150 = vsyncadd [#allocation3], 4294967168 }
  0x36   :  { %1151 = dma.done.wait [#allocation6], 10368  }
  0x37   :  { %1152 = vsyncadd [#allocation6], 4294956928  ;;  %v903_v0 = vld [vmem:[#allocation7 + $0x4] ss:$16 sps:$4 sm:$0xff]   ;;  %v905_v1 = vld [vmem:[#allocation7 + $0xc] ss:$16 sps:$4 sm:$0xff]  }
  0x38   :  { %577 = vmatprep.subr.bf16.mxu0 %v903_v0  ;;  %v907_v2 = vld [vmem:[#allocation7] ss:$16 sps:$4 sm:$0xff]   ;;  %v908_v3 = vld [vmem:[#allocation7 + $0x8] ss:$16 sps:$4 sm:$0xff]   ;;  %659 = vmatprep.subr.bf16.mxu1 %v905_v1  ;;  %v909_v4 = vld [vmem:[#allocation7 + $0x24] ss:$16 sps:$4 sm:$0xff]  }
  0x39   :  { %578 = vmatpush1.bf16.msra.mxu0 %v907_v2  ;;  %660 = vmatpush1.bf16.msra.mxu1 %v908_v3  ;;  %v911_v5 = vld [vmem:[#allocation7 + $0x2c] ss:$16 sps:$4 sm:$0xff]   ;;  %v913_v6 = vld [vmem:[#allocation7 + $0x20] ss:$16 sps:$4 sm:$0xff]   ;;  %v914_v7 = vld [vmem:[#allocation7 + $0x28] ss:$16 sps:$4 sm:$0xff]  }
  0x3a   :  { %579 = vmatprep.subr.bf16.mxu0 %v909_v4  ;;  %661 = vmatprep.subr.bf16.mxu1 %v911_v5  ;;  %v915_v8 = vld [vmem:[#allocation7 + $0x44] ss:$16 sps:$4 sm:$0xff]   ;;  %v917_v9 = vld [vmem:[#allocation7 + $0x4c] ss:$16 sps:$4 sm:$0xff]   ;;  %v919_v10 = vld [vmem:[#allocation7 + $0x40] ss:$16 sps:$4 sm:$0xff]  }
  0x3b   :  { %v920_v11 = vld [vmem:[#allocation7 + $0x48] ss:$16 sps:$4 sm:$0xff]   ;;  %v921_v12 = vld [vmem:[#allocation7 + $0x64] ss:$16 sps:$4 sm:$0xff]   ;;  %v923_v13 = vld [vmem:[#allocation7 + $0x6c] ss:$16 sps:$4 sm:$0xff]  }
  0x3c   :  { %v925_v14 = vld [vmem:[#allocation7 + $0x60] ss:$16 sps:$4 sm:$0xff]   ;;  %v926_v15 = vld [vmem:[#allocation7 + $0x68] ss:$16 sps:$4 sm:$0xff]   ;;  %v927_v16 = vld [vmem:[#allocation7 + $0x84] ss:$16 sps:$4 sm:$0xff]  }
  0x3d   :  { %580 = vmatpush1.bf16.msra.mxu0 %v913_v6  ;;  %662 = vmatpush1.bf16.msra.mxu1 %v914_v7  ;;  %v929_v17 = vld [vmem:[#allocation7 + $0x8c] ss:$16 sps:$4 sm:$0xff]   ;;  %v931_v18 = vld [vmem:[#allocation7 + $0x80] ss:$16 sps:$4 sm:$0xff]   ;;  %v932_v19 = vld [vmem:[#allocation7 + $0x88] ss:$16 sps:$4 sm:$0xff]  }
  0x3e   :  { %581 = vmatprep.subr.bf16.mxu0 %v915_v8  ;;  %663 = vmatprep.subr.bf16.mxu1 %v917_v9  ;;  %v933_v20 = vld [vmem:[#allocation7 + $0xa4] ss:$16 sps:$4 sm:$0xff]   ;;  %v935_v21 = vld [vmem:[#allocation7 + $0xac] ss:$16 sps:$4 sm:$0xff]   ;;  %v937_v22 = vld [vmem:[#allocation7 + $0xa0] ss:$16 sps:$4 sm:$0xff]  }
  0x3f   :  { %v938_v23 = vld [vmem:[#allocation7 + $0xa8] ss:$16 sps:$4 sm:$0xff]   ;;  %v939_v24 = vld [vmem:[#allocation7 + $0xc4] ss:$16 sps:$4 sm:$0xff]   ;;  %v941_v25 = vld [vmem:[#allocation7 + $0xcc] ss:$16 sps:$4 sm:$0xff]  }
  0x40   :  { %v943_v26 = vld [vmem:[#allocation7 + $0xc0] ss:$16 sps:$4 sm:$0xff]   ;;  %v944_v27 = vld [vmem:[#allocation7 + $0xc8] ss:$16 sps:$4 sm:$0xff]   ;;  %v945_v28 = vld [vmem:[#allocation7 + $0xe4] ss:$16 sps:$4 sm:$0xff]  }
  0x41   :  { %582 = vmatpush1.bf16.msra.mxu0 %v919_v10  ;;  %664 = vmatpush1.bf16.msra.mxu1 %v920_v11  ;;  %v947_v29 = vld [vmem:[#allocation7 + $0xec] ss:$16 sps:$4 sm:$0xff]   ;;  %v949_v30 = vld [vmem:[#allocation7 + $0xe0] ss:$16 sps:$4 sm:$0xff]   ;;  %v950_v31 = vld [vmem:[#allocation7 + $0xe8] ss:$16 sps:$4 sm:$0xff]  }
  0x42   :  { %583 = vmatprep.subr.bf16.mxu0 %v921_v12  ;;  %665 = vmatprep.subr.bf16.mxu1 %v923_v13  ;;  %v951_v32 = vld [vmem:[#allocation7 + $0x104] ss:$16 sps:$4 sm:$0xff]   ;;  %v953_v33 = vld [vmem:[#allocation7 + $0x10c] ss:$16 sps:$4 sm:$0xff]   ;;  %v955_v34 = vld [vmem:[#allocation7 + $0x100] ss:$16 sps:$4 sm:$0xff]  }
  0x43   :  { %v956_v35 = vld [vmem:[#allocation7 + $0x108] ss:$16 sps:$4 sm:$0xff]   ;;  %v957_v36 = vld [vmem:[#allocation7 + $0x124] ss:$16 sps:$4 sm:$0xff]   ;;  %v959_v37 = vld [vmem:[#allocation7 + $0x12c] ss:$16 sps:$4 sm:$0xff]  }
  0x44   :  { %v961_v38 = vld [vmem:[#allocation7 + $0x120] ss:$16 sps:$4 sm:$0xff]   ;;  %v962_v39 = vld [vmem:[#allocation7 + $0x128] ss:$16 sps:$4 sm:$0xff]   ;;  %v963_v40 = vld [vmem:[#allocation7 + $0x144] ss:$16 sps:$4 sm:$0xff]  }
  0x45   :  { %584 = vmatpush1.bf16.msra.mxu0 %v925_v14  ;;  %666 = vmatpush1.bf16.msra.mxu1 %v926_v15  ;;  %v965_v41 = vld [vmem:[#allocation7 + $0x14c] ss:$16 sps:$4 sm:$0xff]   ;;  %v967_v42 = vld [vmem:[#allocation7 + $0x140] ss:$16 sps:$4 sm:$0xff]   ;;  %v968_v43 = vld [vmem:[#allocation7 + $0x148] ss:$16 sps:$4 sm:$0xff]  }
  0x46   :  { %585 = vmatprep.subr.bf16.mxu0 %v927_v16  ;;  %667 = vmatprep.subr.bf16.mxu1 %v929_v17  ;;  %v969_v44 = vld [vmem:[#allocation7 + $0x164] ss:$16 sps:$4 sm:$0xff]   ;;  %v971_v45 = vld [vmem:[#allocation7 + $0x16c] ss:$16 sps:$4 sm:$0xff]   ;;  %v973_v47 = vld [vmem:[#allocation7 + $0x160] ss:$16 sps:$4 sm:$0xff]  }
  0x47   :  { %v67_v46 = vld [vmem:[%s1275_s1] sm:$0xff]  ;;  %v974_v49 = vld [vmem:[#allocation7 + $0x168] ss:$16 sps:$4 sm:$0xff]   ;;  %v977_v51 = vld [vmem:[#allocation7 + $0x18c] ss:$16 sps:$4 sm:$0xff]   ;;  %v1162_v14 = vmov 0  }
  0x48   :  { %v68_v48 = vpack.c.bf16 %v67_v46, %v67_v46  ;;  %v975_v50 = vld [vmem:[#allocation7 + $0x184] ss:$16 sps:$4 sm:$0xff]   ;;  %v979_v52 = vld [vmem:[#allocation7 + $0x180] ss:$16 sps:$4 sm:$0xff]   ;;  %v980_v53 = vld [vmem:[#allocation7 + $0x188] ss:$16 sps:$4 sm:$0xff]  }
  0x49   :  { %586 = vmatpush1.bf16.msra.mxu0 %v931_v18  ;;  %668 = vmatpush1.bf16.msra.mxu1 %v932_v19  ;;  %v981_v54 = vld [vmem:[#allocation7 + $0x1a4] ss:$16 sps:$4 sm:$0xff]   ;;  %v983_v55 = vld [vmem:[#allocation7 + $0x1ac] ss:$16 sps:$4 sm:$0xff]   ;;  %v985_v56 = vld [vmem:[#allocation7 + $0x1a0] ss:$16 sps:$4 sm:$0xff]  }
  0x4a   :  { %587 = vmatprep.subr.bf16.mxu0 %v933_v20  ;;  %669 = vmatprep.subr.bf16.mxu1 %v935_v21  ;;  %v986_v57 = vld [vmem:[#allocation7 + $0x1a8] ss:$16 sps:$4 sm:$0xff]   ;;  %v987_v58 = vld [vmem:[#allocation7 + $0x1c4] ss:$16 sps:$4 sm:$0xff]   ;;  %v989_v59 = vld [vmem:[#allocation7 + $0x1cc] ss:$16 sps:$4 sm:$0xff]  }
  0x4b   :  { %609 = vmatprep.mubr.bf16.mxu0 %v68_v48  ;;  %691 = vmatprep.mubr.bf16.mxu1 %v68_v48  ;;  %v991_v60 = vld [vmem:[#allocation7 + $0x1c0] ss:$16 sps:$4 sm:$0xff]   ;;  %v992_v61 = vld [vmem:[#allocation7 + $0x1c8] ss:$16 sps:$4 sm:$0xff]   ;;  %v993_v62 = vld [vmem:[#allocation7 + $0x1e4] ss:$16 sps:$4 sm:$0xff]  }
  0x4c   :  { %v995_v63 = vld [vmem:[#allocation7 + $0x1ec] ss:$16 sps:$4 sm:$0xff]   ;;  %v997_v0 = vld [vmem:[#allocation7 + $0x1e0] ss:$16 sps:$4 sm:$0xff]   ;;  %v998_v1 = vld [vmem:[#allocation7 + $0x1e8] ss:$16 sps:$4 sm:$0xff]  }
  0x4d   :  { %588 = vmatpush1.bf16.msra.mxu0 %v937_v22  ;;  %670 = vmatpush1.bf16.msra.mxu1 %v938_v23  ;;  %v65_v2 = vld [vmem:[#allocation2] sm:$0xff]  ;;  %v1004_v4 = vld [vmem:[#allocation7 + $0x20c] ss:$16 sps:$4 sm:$0xff]   ;;  %v1002_v7 = vld [vmem:[#allocation7 + $0x208] ss:$16 sps:$4 sm:$0xff]   ;;  %vm573_vm0 = vcmask 523264   ;;  %v153_v23 = vlaneseq }
  0x4e   :  { %589 = vmatprep.subr.bf16.mxu0 %v939_v24  ;;  %671 = vmatprep.subr.bf16.mxu1 %v941_v25  ;;  %v1001_v3 = vld [vmem:[#allocation7 + $0x204] ss:$16 sps:$4 sm:$0xff]   ;;  %v66_v5 = vpack.c.bf16 %v65_v2, %v65_v2  ;;  %v999_v6 = vld [vmem:[#allocation7 + $0x200] ss:$16 sps:$4 sm:$0xff]   ;;  %v1010_v9 = vld [vmem:[#allocation7 + $0x22c] ss:$16 sps:$4 sm:$0xff]  }
  0x4f   :  { %v1007_v8 = vld [vmem:[#allocation7 + $0x224] ss:$16 sps:$4 sm:$0xff]   ;;  %v1005_v10 = vld [vmem:[#allocation7 + $0x220] ss:$16 sps:$4 sm:$0xff]   ;;  %v1008_v11 = vld [vmem:[#allocation7 + $0x228] ss:$16 sps:$4 sm:$0xff]  }
  0x50   :  { %v1013_v12 = vld [vmem:[#allocation7 + $0x244] ss:$16 sps:$4 sm:$0xff]   ;;  %v1016_v13 = vld [vmem:[#allocation7 + $0x24c] ss:$16 sps:$4 sm:$0xff]   ;;  %v1011_v15 = vld [vmem:[#allocation7 + $0x240] ss:$16 sps:$4 sm:$0xff]  }
  0x51   :  { %590 = vmatpush1.bf16.msra.mxu0 %v943_v26  ;;  %672 = vmatpush1.bf16.msra.mxu1 %v944_v27  ;;  %v1014_v16 = vld [vmem:[#allocation7 + $0x248] ss:$16 sps:$4 sm:$0xff]   ;;  %v1019_v17 = vld [vmem:[#allocation7 + $0x264] ss:$16 sps:$4 sm:$0xff]   ;;  %v1022_v18 = vld [vmem:[#allocation7 + $0x26c] ss:$16 sps:$4 sm:$0xff]  }
  0x52   :  { %591 = vmatprep.subr.bf16.mxu0 %v945_v28  ;;  %673 = vmatprep.subr.bf16.mxu1 %v947_v29  ;;  %v1017_v19 = vld [vmem:[#allocation7 + $0x260] ss:$16 sps:$4 sm:$0xff]   ;;  %v1020_v20 = vld [vmem:[#allocation7 + $0x268] ss:$16 sps:$4 sm:$0xff]   ;;  %v154_v24 = vshrl.u32 %v153_v23, 7 }
  0x53   :  { %v69_v21 = vld [vmem:[%s1276_s2] sm:$0xff]  ;;  %s1163_s2 = smov [#allocation9]  }
  0x54   :  { %v70_v22 = vpack.c.bf16 %v69_v21, %v69_v21  ;;  %v155_v25 = vsub.s32 0, %v154_v24  ;;  %v151_v26 = vld [vmem:[%s1279_s5] sm:$0xf]  ;;  %v159_v27 = vsub.s32 1, %v154_v24  ;;  %s784_s5 = sshll.u32 %s1163_s2, 4  ;;  %s785_s5 = int_to_ptr.vmem [resolvable:$true] %s784_s5 }
  0x55   :  { %592 = vmatpush1.bf16.msra.mxu0 %v949_v30  ;;  %674 = vmatpush1.bf16.msra.mxu1 %v950_v31  ;;  %s1105_s18 = scalar_lea.vmem %s785_s5, 128  ;;  %p1110_p11 = scmp.lt.s32.totalorder %s785_s5, %s785_s5 }
  0x56   :  { %593 = vmatprep.subr.bf16.mxu0 %v951_v32  ;;  %675 = vmatprep.subr.bf16.mxu1 %v953_v33  ;;  %v156_v28 = vrot.slane %v151_v26, %v155_v25  ;;  %v160_v29 = vrot.slane %v151_v26, %v159_v27  ;;  %v163_v33 = vsub.s32 2, %v154_v24  ;;  %p1106_p10 = scmp.ne.s32.totalorder %s785_s5, %s1105_s18  ;;  %p1111_p12 = scmp.lt.s32.totalorder %s1105_s18, %s1105_s18 }
  0x58   :  { %p1112_p13 = por %p1111_p12, %p1110_p11 }
  0x59   :  { %594 = vmatpush1.bf16.msra.mxu0 %v955_v34  ;;  %676 = vmatpush1.bf16.msra.mxu1 %v956_v35 }
  0x5a   :  { %595 = vmatprep.subr.bf16.mxu0 %v957_v36  ;;  %677 = vmatprep.subr.bf16.mxu1 %v959_v37  ;;  %p1113_p0 = pnand %p1112_p13, %p1106_p10 }
  0x5d   :  { %596 = vmatpush1.bf16.msra.mxu0 %v961_v38  ;;  %678 = vmatpush1.bf16.msra.mxu1 %v962_v39 }
  0x5e   :  { %597 = vmatprep.subr.bf16.mxu0 %v963_v40  ;;  %679 = vmatprep.subr.bf16.mxu1 %v965_v41 }
  0x61   :  { %598 = vmatpush1.bf16.msra.mxu0 %v967_v42  ;;  %680 = vmatpush1.bf16.msra.mxu1 %v968_v43  ;;  %v167_v43 = vsub.s32 3, %v154_v24 }
  0x62   :  { %599 = vmatprep.subr.bf16.mxu0 %v969_v44  ;;  %681 = vmatprep.subr.bf16.mxu1 %v971_v45  ;;  %v164_v44 = vrot.slane %v151_v26, %v163_v33 }
  0x63   :  { %v168_v45 = vrot.slane %v151_v26, %v167_v43 }
  0x65   :  { %600 = vmatpush1.bf16.msra.mxu0 %v973_v47  ;;  %682 = vmatpush1.bf16.msra.mxu1 %v974_v49 }
  0x66   :  { %601 = vmatprep.subr.bf16.mxu0 %v975_v50  ;;  %683 = vmatprep.subr.bf16.mxu1 %v977_v51 }
  0x69   :  { %602 = vmatpush1.bf16.msra.mxu0 %v979_v52  ;;  %684 = vmatpush1.bf16.msra.mxu1 %v980_v53 }
  0x6a   :  { %603 = vmatprep.subr.bf16.mxu0 %v981_v54  ;;  %685 = vmatprep.subr.bf16.mxu1 %v983_v55 }
  0x6d   :  { %604 = vmatpush1.bf16.msra.mxu0 %v985_v56  ;;  %686 = vmatpush1.bf16.msra.mxu1 %v986_v57  ;;  %v760_v56 = vld [vmem:[#allocation5] sm:$0xff] }
  0x6e   :  { %605 = vmatprep.subr.bf16.mxu0 %v987_v58  ;;  %687 = vmatprep.subr.bf16.mxu1 %v989_v59 }
  0x71   :  { %606 = vmatpush1.bf16.msra.mxu0 %v991_v60  ;;  %688 = vmatpush1.bf16.msra.mxu1 %v992_v61 }
  0x72   :  { %607 = vmatprep.subr.bf16.mxu0 %v993_v62  ;;  %689 = vmatprep.subr.bf16.mxu1 %v995_v63 }
  0x75   :  { %608 = vmatpush1.bf16.msra.mxu0 %v997_v0  ;;  %690 = vmatpush1.bf16.msra.mxu1 %v998_v1 }
  0x76   :  { %618 = vmatprep.subr.bf16.mxu0 %v1001_v3  ;;  %700 = vmatprep.subr.bf16.mxu1 %v1004_v4 }
  0x78   :  { %610 = vmatmul.mubr.bf16.vlgmr.msra.gmra.mrb[0].mxu0 %v66_v5  ;;  %692 = vmatmul.mubr.bf16.vlgmr.msra.gmra.mrb[0].mxu1 %v66_v5 }
  0x79   :  { %619 = vmatpush1.bf16.msra.mxu0 %v999_v6  ;;  %701 = vmatpush1.bf16.msra.mxu1 %v1002_v7 }
  0x7a   :  { %620 = vmatprep.subr.bf16.mxu0 %v1007_v8  ;;  %702 = vmatprep.subr.bf16.mxu1 %v1010_v9 }
  0x7b   :  { %650 = vmatprep.mubr.bf16.mxu0 %v1162_v14  ;;  %732 = vmatprep.mubr.bf16.mxu1 %v1162_v14 }
  0x7d   :  { %621 = vmatpush1.bf16.msra.mxu0 %v1005_v10  ;;  %703 = vmatpush1.bf16.msra.mxu1 %v1008_v11 }
  0x7e   :  { %622 = vmatprep.subr.bf16.mxu0 %v1013_v12  ;;  %704 = vmatprep.subr.bf16.mxu1 %v1016_v13 }
  0x81   :  { %623 = vmatpush1.bf16.msra.mxu0 %v1011_v15  ;;  %705 = vmatpush1.bf16.msra.mxu1 %v1014_v16 }
  0x82   :  { %624 = vmatprep.subr.bf16.mxu0 %v1019_v17  ;;  %706 = vmatprep.subr.bf16.mxu1 %v1022_v18 }
  0x85   :  { %625 = vmatpush1.bf16.msra.mxu0 %v1017_v19  ;;  %707 = vmatpush1.bf16.msra.mxu1 %v1020_v20 }
  0x88   :  { %878 = vmatmul.mubr.msk.bf16.vlgmr.msra.gmra.mrb[0].mxu0 %vm573_vm0, %v70_v22  ;;  %879 = vmatmul.mubr.msk.bf16.vlgmr.msra.gmra.mrb[0].mxu1 %vm573_vm0, %v70_v22 }
 0x15b   :  { %v652_v30 = vpop.f32.mrb[0].mxu0  ;;  %v734_v31 = vpop.f32.mrb[0].mxu1 }
 0x15c   :  { %v883_v32 = vadd.f32 %v652_v30, %v156_v28  ;;  %v654_v34 = vpop.f32.mrb[1].mxu0  ;;  %v736_v35 = vpop.f32.mrb[1].mxu1  ;;  %v885_v46 = vadd.f32 %v734_v31, %v164_v44 }
 0x15d   :  { %v884_v36 = vadd.f32 %v654_v34, %v160_v29  ;;  %v656_v37 = vpop.f32.mrb[2].mxu0  ;;  %v738_v38 = vpop.f32.mrb[2].mxu1  ;;  %v886_v47 = vadd.f32 %v736_v35, %v168_v45 }
 0x15e   :  { %v880_v39 = vmul.f32 -1.442695, %v883_v32  ;;  %v657_v40 = vpop.f32.mrb[3].mxu0  ;;  %v739_v41 = vpop.f32.mrb[3].mxu1  ;;  %v882_v48 = vmul.f32 -1.442695, %v885_v46 }
 0x15f   :  { %v881_v42 = vmul.f32 -1.442695, %v884_v36 }
 0x160   :  { %1023 = vpow2.f32 %v880_v39 }
 0x161   :  { %1025 = vpow2.f32 %v881_v42 }
 0x162   :  { %1027 = vtanh.f32 %v886_v47 }
 0x163   :  { %1029 = vpow2.f32 %v882_v48 }
 0x16a   :  { %v1024_v49 = vpop.eup %1023 }
 0x16b   :  { %v750_v50 = vadd.f32 1.0, %v1024_v49  ;;  %v1026_v51 = vpop.eup %1025 }
 0x16c   :  { %v751_v52 = vadd.f32 1.0, %v1026_v51  ;;  %v1028_v53 = vpop.eup %1027 }
 0x16d   :  { %1031 = vrcp.f32 %v750_v50  ;;  %v1030_v54 = vpop.eup %1029 }
 0x16e   :  { %1033 = vrcp.f32 %v751_v52  ;;  %v752_v59 = vadd.f32 1.0, %v1030_v54 }
 0x170   :  { %1035 = vrcp.f32 %v752_v59 }
 0x177   :  { %v1032_v55 = vpop.eup %1031 }
 0x178   :  { %v762_v57 = vmul.f32 %v1032_v55, %v1028_v53  ;;  %v1034_v58 = vpop.eup %1033 }
 0x179   :  { %v761_v60 = vmul.f32 %v1034_v58, %v760_v56 }
 0x17b   :  { %v763_v61 = vadd.f32 %v762_v57, %v761_v60 }
 0x17d   :  { %767 = vst [vmem:[#allocation9] sm:$0xff] %v763_v61  ;;  %1037 = vtanh.f32 %v763_v61 }
 0x17e   :  { %1116 = shalt.err (!%p1113_p0)
}
 0x17f   :  { %s1117_s21 = scalar_lea.hbm %s1281_s7, 128 }
 0x180   :  { %p1118_p1 = scmp.ne.s32.totalorder %s1281_s7, %s1117_s21  ;;  %p1121_p2 = scmp.lt.u32.totalorder %s1117_s21, %s1281_s7 }
 0x182   :  { %p1123_p3 = pnand %p1121_p2, %p1118_p1 }
 0x184   :  { %1126 = shalt.err (!%p1123_p3)
}
 0x185   :  { %787 = dma.vmem_to_hbm [thread:$0]  %s785_s5, 128, %s1281_s7, [#allocation10]   ;;  %v1036_v62 = vpop.eup %1035 }
 0x186   :  { %s1164_s28 = smov [#allocation8]  }
 0x187   :  { %s774_s29 = sshll.u32 %s1164_s28, 4  ;;  %v1038_v63 = vpop.eup %1037  ;;  %s775_s29 = int_to_ptr.vmem [resolvable:$true] %s774_s29 }
 0x188   :  { %v765_v0 = vmul.f32 %v1038_v63, %v1036_v62  ;;  %s1127_s30 = scalar_lea.vmem %s775_s29, 128  ;;  %p1132_p5 = scmp.lt.s32.totalorder %s775_s29, %s775_s29 }
 0x189   :  { %p1128_p4 = scmp.ne.s32.totalorder %s775_s29, %s1127_s30  ;;  %p1133_p6 = scmp.lt.s32.totalorder %s1127_s30, %s1127_s30 }
 0x18a   :  { %766 = vst [vmem:[#allocation8] sm:$0xff] %v765_v0 }
 0x18b   :  { %p1134_p7 = por %p1133_p6, %p1132_p5 }
 0x18d   :  { %p1135_p8 = pnand %p1134_p7, %p1128_p4 }
 0x18f   :  { %1138 = shalt.err (!%p1135_p8)
}
 0x190   :  { %s1139_s10 = scalar_lea.hbm %s1280_s6, 128 }
 0x191   :  { %p1140_p9 = scmp.ne.s32.totalorder %s1280_s6, %s1139_s10  ;;  %p1143_p10 = scmp.lt.u32.totalorder %s1139_s10, %s1280_s6 }
 0x193   :  { %p1145_p11 = pnand %p1143_p10, %p1140_p9 }
 0x195   :  { %1148 = shalt.err (!%p1145_p11)
}
 0x196   :  { %777 = dma.vmem_to_hbm [thread:$0]  %s775_s29, 128, %s1280_s6, [#allocation4]  }
 0x197   :  { %1153 = dma.done.wait [#allocation4], 128  }
 0x198   :  { %1154 = vsyncadd [#allocation4], 4294967168 }
 0x199   :  { %1155 = dma.done.wait [#allocation10], 128  }
 0x19a   :  { %1156 = vsyncadd [#allocation10], 4294967168 }
 0x19b   :  { %794 = vsyncpa [#allocation3], 1 }
 0x19c   :  { %795 = vsyncpa [#allocation6], 1 }
 0x19d   :  { %796 = vsyncpa [#allocation4], 1 }
 0x19e   :  { %797 = vsyncpa [#allocation10], 1 }

// kernel: tpu_custom_call.1
= control target key start
LH: loop header
LB: loop body
LE: loop exit
PB: predicated region body
PF: predicated region fallthrough
CT: control target
= control target key end

     0   :  { %13 = vsyncpa [#allocation3], 0  ;;  %s1329_s0 = inlined_call_operand.hbm [shape: f32[8,128], index: 0, kind: input, shape index: {}]   ;;  %s1330_s1 = inlined_call_operand.hbm [shape: f32[8,128], index: 1, kind: input, shape index: {}]   ;;  %s1331_s2 = inlined_call_operand.hbm [shape: f32[8,64], index: 2, kind: input, shape index: {}]   ;;  %s1332_s3 = inlined_call_operand.vmem [shape: f32[8,128], index: 3, kind: input, shape index: {}]   ;;  %s1333_s4 = inlined_call_operand.hbm [shape: bf16[320,512], index: 4, kind: input, shape index: {}]   ;;  %s1334_s5 = inlined_call_operand.vmem [shape: f32[1,512], index: 5, kind: input, shape index: {}]   ;;  %s1335_s6 = inlined_call_operand.hbm [shape: f32[8,128], index: 6, kind: output, shape index: {0}]   ;;  %s1336_s7 = inlined_call_operand.hbm [shape: f32[8,128], index: 7, kind: output, shape index: {1}]  }
   0x1   :  { %14 = vsyncpa [#allocation6], 0 }
   0x2   :  { %15 = vsyncpa [#allocation9], 0 }
   0x3   :  { %16 = vsyncpa [#allocation4], 0 }
   0x4   :  { %17 = vsyncpa [#allocation12], 0  ;;  %s1195_s24 = smov [#allocation5]   ;;  %s1196_s26 = smov [#allocation2]  }
   0x5   :  { %s34_s25 = sshll.u32 %s1195_s24, 4  ;;  %s24_s27 = sshll.u32 %s1196_s26, 4  ;;  %s35_s25 = int_to_ptr.vmem [resolvable:$true] %s34_s25  ;;  %s25_s27 = int_to_ptr.vmem [resolvable:$true] %s24_s27 }
   0x6   :  { %s1053_s30 = scalar_lea.hbm %s1330_s1, 128 }
   0x7   :  { %p1054_p0 = scmp.ne.s32.totalorder %s1330_s1, %s1053_s30  ;;  %p1057_p1 = scmp.lt.u32.totalorder %s1053_s30, %s1330_s1 }
   0x9   :  { %p1059_p2 = pnand %p1057_p1, %p1054_p0 }
   0xb   :  { %1062 = shalt.err (!%p1059_p2)
}
   0xc   :  { %s1063_s12 = scalar_lea.vmem %s35_s25, 128  ;;  %p1068_p4 = scmp.lt.s32.totalorder %s35_s25, %s35_s25 }
   0xd   :  { %p1064_p3 = scmp.ne.s32.totalorder %s35_s25, %s1063_s12  ;;  %p1069_p5 = scmp.lt.s32.totalorder %s1063_s12, %s1063_s12 }
   0xf   :  { %p1070_p6 = por %p1069_p5, %p1068_p4 }
  0x11   :  { %p1071_p7 = pnand %p1070_p6, %p1064_p3 }
  0x13   :  { %1074 = shalt.err (!%p1071_p7)
}
  0x14   :  { %37 = dma.hbm_to_vmem [thread:$0]  %s1330_s1, 128, %s35_s25, [#allocation6]  }
  0x15   :  { %s1075_s17 = scalar_lea.hbm %s1329_s0, 128 }
  0x16   :  { %p1076_p8 = scmp.ne.s32.totalorder %s1329_s0, %s1075_s17  ;;  %p1079_p9 = scmp.lt.u32.totalorder %s1075_s17, %s1329_s0 }
  0x18   :  { %p1081_p10 = pnand %p1079_p9, %p1076_p8 }
  0x1a   :  { %1084 = shalt.err (!%p1081_p10)
}
  0x1b   :  { %s1085_s22 = scalar_lea.vmem %s25_s27, 128  ;;  %p1090_p12 = scmp.lt.s32.totalorder %s25_s27, %s25_s27 }
  0x1c   :  { %p1086_p11 = scmp.ne.s32.totalorder %s25_s27, %s1085_s22  ;;  %p1091_p13 = scmp.lt.s32.totalorder %s1085_s22, %s1085_s22 }
  0x1e   :  { %p1092_p0 = por %p1091_p13, %p1090_p12 }
  0x20   :  { %p1093_p1 = pnand %p1092_p0, %p1086_p11 }
  0x22   :  { %1096 = shalt.err (!%p1093_p1)
}
  0x23   :  { %27 = dma.hbm_to_vmem [thread:$0]  %s1329_s0, 128, %s25_s27, [#allocation3]  }
  0x24   :  { %s1197_s24 = smov [#allocation7]   ;;  %s1198_s26 = smov [#allocation8]  }
  0x25   :  { %s44_s25 = sshll.u32 %s1197_s24, 4  ;;  %s55_s28 = sshll.u32 %s1198_s26, 4  ;;  %s45_s25 = int_to_ptr.vmem [resolvable:$true] %s44_s25  ;;  %s1268_s28 = int_to_ptr.vmem [resolvable:$true] %s55_s28 }
  0x26   :  { %s1097_s8 = scalar_lea.hbm %s1331_s2, 128 }
  0x27   :  { %p1098_p2 = scmp.ne.s32.totalorder %s1331_s2, %s1097_s8  ;;  %p1101_p3 = scmp.lt.u32.totalorder %s1097_s8, %s1331_s2 }
  0x29   :  { %p1103_p4 = pnand %p1101_p3, %p1098_p2 }
  0x2b   :  { %1106 = shalt.err (!%p1103_p4)
}
  0x2c   :  { %s1107_s0 = scalar_lea.vmem %s45_s25, 128  ;;  %p1112_p6 = scmp.lt.s32.totalorder %s45_s25, %s45_s25 }
  0x2d   :  { %p1108_p5 = scmp.ne.s32.totalorder %s45_s25, %s1107_s0  ;;  %p1113_p7 = scmp.lt.s32.totalorder %s1107_s0, %s1107_s0 }
  0x2f   :  { %p1114_p8 = por %p1113_p7, %p1112_p6 }
  0x31   :  { %p1115_p9 = pnand %p1114_p8, %p1108_p5 }
  0x33   :  { %1118 = shalt.err (!%p1115_p9)
}
  0x34   :  { %47 = dma.hbm_to_vmem [thread:$0]  %s1331_s2, 128, %s45_s25, [#allocation6]  }
  0x35   :  { %s1119_s16 = scalar_lea.hbm %s1333_s4, 10240 }
  0x36   :  { %p1120_p10 = scmp.ne.s32.totalorder %s1333_s4, %s1119_s16  ;;  %p1123_p11 = scmp.lt.u32.totalorder %s1119_s16, %s1333_s4 }
  0x38   :  { %p1125_p12 = pnand %p1123_p11, %p1120_p10 }
  0x3a   :  { %1128 = shalt.err (!%p1125_p12)
}
  0x3b   :  { %s1129_s21 = scalar_lea.vmem %s1268_s28, 10240  ;;  %p1134_p0 = scmp.lt.s32.totalorder %s1268_s28, %s1268_s28 }
  0x3c   :  { %p1130_p13 = scmp.ne.s32.totalorder %s1268_s28, %s1129_s21  ;;  %p1135_p1 = scmp.lt.s32.totalorder %s1129_s21, %s1129_s21 }
  0x3e   :  { %p1136_p2 = por %p1135_p1, %p1134_p0 }
  0x40   :  { %p1137_p3 = pnand %p1136_p2, %p1130_p13 }
  0x42   :  { %1140 = shalt.err (!%p1137_p3)
}
  0x43   :  { %s1199_s2 = smov 256   ;;  %s1200_s22 = smov 16  }
  0x44   :  { %61 = dma.hbm_to_vmem [thread:$0]  %s1333_s4, 10240, %s1268_s28, [#allocation9], %s1199_s2, %s1199_s2, %s1200_s22  }
  0x45   :  { %1185 = dma.done.wait [#allocation3], 128  }
  0x46   :  { %1186 = vsyncadd [#allocation3], 4294967168 }
  0x47   :  { %1187 = dma.done.wait [#allocation6], 256  }
  0x48   :  { %1188 = vsyncadd [#allocation6], 4294967040 }
  0x49   :  { %1189 = dma.done.wait [#allocation9], 10240  }
  0x4a   :  { %1190 = vsyncadd [#allocation9], 4294957056  ;;  %v917_v0 = vld [vmem:[#allocation8 + $0x4] ss:$16 sps:$4 sm:$0xff]   ;;  %v919_v1 = vld [vmem:[#allocation8 + $0xc] ss:$16 sps:$4 sm:$0xff]  }
  0x4b   :  { %589 = vmatprep.subr.bf16.mxu0 %v917_v0  ;;  %v921_v2 = vld [vmem:[#allocation8] ss:$16 sps:$4 sm:$0xff]   ;;  %v922_v3 = vld [vmem:[#allocation8 + $0x8] ss:$16 sps:$4 sm:$0xff]   ;;  %671 = vmatprep.subr.bf16.mxu1 %v919_v1  ;;  %v923_v4 = vld [vmem:[#allocation8 + $0x24] ss:$16 sps:$4 sm:$0xff]  }
  0x4c   :  { %590 = vmatpush1.bf16.msra.mxu0 %v921_v2  ;;  %672 = vmatpush1.bf16.msra.mxu1 %v922_v3  ;;  %v925_v5 = vld [vmem:[#allocation8 + $0x2c] ss:$16 sps:$4 sm:$0xff]   ;;  %v927_v6 = vld [vmem:[#allocation8 + $0x20] ss:$16 sps:$4 sm:$0xff]   ;;  %v928_v7 = vld [vmem:[#allocation8 + $0x28] ss:$16 sps:$4 sm:$0xff]  }
  0x4d   :  { %591 = vmatprep.subr.bf16.mxu0 %v923_v4  ;;  %673 = vmatprep.subr.bf16.mxu1 %v925_v5  ;;  %v929_v8 = vld [vmem:[#allocation8 + $0x44] ss:$16 sps:$4 sm:$0xff]   ;;  %v931_v9 = vld [vmem:[#allocation8 + $0x4c] ss:$16 sps:$4 sm:$0xff]   ;;  %v933_v10 = vld [vmem:[#allocation8 + $0x40] ss:$16 sps:$4 sm:$0xff]  }
  0x4e   :  { %v934_v11 = vld [vmem:[#allocation8 + $0x48] ss:$16 sps:$4 sm:$0xff]   ;;  %v935_v12 = vld [vmem:[#allocation8 + $0x64] ss:$16 sps:$4 sm:$0xff]   ;;  %v937_v13 = vld [vmem:[#allocation8 + $0x6c] ss:$16 sps:$4 sm:$0xff]  }
  0x4f   :  { %v939_v14 = vld [vmem:[#allocation8 + $0x60] ss:$16 sps:$4 sm:$0xff]   ;;  %v940_v15 = vld [vmem:[#allocation8 + $0x68] ss:$16 sps:$4 sm:$0xff]   ;;  %v941_v16 = vld [vmem:[#allocation8 + $0x84] ss:$16 sps:$4 sm:$0xff]  }
  0x50   :  { %592 = vmatpush1.bf16.msra.mxu0 %v927_v6  ;;  %674 = vmatpush1.bf16.msra.mxu1 %v928_v7  ;;  %v943_v17 = vld [vmem:[#allocation8 + $0x8c] ss:$16 sps:$4 sm:$0xff]   ;;  %v945_v18 = vld [vmem:[#allocation8 + $0x80] ss:$16 sps:$4 sm:$0xff]   ;;  %v946_v19 = vld [vmem:[#allocation8 + $0x88] ss:$16 sps:$4 sm:$0xff]  }
  0x51   :  { %593 = vmatprep.subr.bf16.mxu0 %v929_v8  ;;  %675 = vmatprep.subr.bf16.mxu1 %v931_v9  ;;  %v947_v20 = vld [vmem:[#allocation8 + $0xa4] ss:$16 sps:$4 sm:$0xff]   ;;  %v949_v21 = vld [vmem:[#allocation8 + $0xac] ss:$16 sps:$4 sm:$0xff]   ;;  %v951_v22 = vld [vmem:[#allocation8 + $0xa0] ss:$16 sps:$4 sm:$0xff]  }
  0x52   :  { %v952_v23 = vld [vmem:[#allocation8 + $0xa8] ss:$16 sps:$4 sm:$0xff]   ;;  %v953_v24 = vld [vmem:[#allocation8 + $0xc4] ss:$16 sps:$4 sm:$0xff]   ;;  %v955_v25 = vld [vmem:[#allocation8 + $0xcc] ss:$16 sps:$4 sm:$0xff]  }
  0x53   :  { %v957_v26 = vld [vmem:[#allocation8 + $0xc0] ss:$16 sps:$4 sm:$0xff]   ;;  %v958_v27 = vld [vmem:[#allocation8 + $0xc8] ss:$16 sps:$4 sm:$0xff]   ;;  %v959_v28 = vld [vmem:[#allocation8 + $0xe4] ss:$16 sps:$4 sm:$0xff]  }
  0x54   :  { %594 = vmatpush1.bf16.msra.mxu0 %v933_v10  ;;  %676 = vmatpush1.bf16.msra.mxu1 %v934_v11  ;;  %v961_v29 = vld [vmem:[#allocation8 + $0xec] ss:$16 sps:$4 sm:$0xff]   ;;  %v963_v30 = vld [vmem:[#allocation8 + $0xe0] ss:$16 sps:$4 sm:$0xff]   ;;  %v964_v31 = vld [vmem:[#allocation8 + $0xe8] ss:$16 sps:$4 sm:$0xff]  }
  0x55   :  { %595 = vmatprep.subr.bf16.mxu0 %v935_v12  ;;  %677 = vmatprep.subr.bf16.mxu1 %v937_v13  ;;  %v965_v32 = vld [vmem:[#allocation8 + $0x104] ss:$16 sps:$4 sm:$0xff]   ;;  %v967_v33 = vld [vmem:[#allocation8 + $0x10c] ss:$16 sps:$4 sm:$0xff]   ;;  %v969_v34 = vld [vmem:[#allocation8 + $0x100] ss:$16 sps:$4 sm:$0xff]  }
  0x56   :  { %v970_v35 = vld [vmem:[#allocation8 + $0x108] ss:$16 sps:$4 sm:$0xff]   ;;  %v971_v36 = vld [vmem:[#allocation8 + $0x124] ss:$16 sps:$4 sm:$0xff]   ;;  %v973_v37 = vld [vmem:[#allocation8 + $0x12c] ss:$16 sps:$4 sm:$0xff]  }
  0x57   :  { %v975_v38 = vld [vmem:[#allocation8 + $0x120] ss:$16 sps:$4 sm:$0xff]   ;;  %v976_v39 = vld [vmem:[#allocation8 + $0x128] ss:$16 sps:$4 sm:$0xff]   ;;  %v977_v40 = vld [vmem:[#allocation8 + $0x144] ss:$16 sps:$4 sm:$0xff]  }
  0x58   :  { %596 = vmatpush1.bf16.msra.mxu0 %v939_v14  ;;  %678 = vmatpush1.bf16.msra.mxu1 %v940_v15  ;;  %v979_v41 = vld [vmem:[#allocation8 + $0x14c] ss:$16 sps:$4 sm:$0xff]   ;;  %v981_v42 = vld [vmem:[#allocation8 + $0x140] ss:$16 sps:$4 sm:$0xff]   ;;  %v982_v43 = vld [vmem:[#allocation8 + $0x148] ss:$16 sps:$4 sm:$0xff]  }
  0x59   :  { %597 = vmatprep.subr.bf16.mxu0 %v941_v16  ;;  %679 = vmatprep.subr.bf16.mxu1 %v943_v17  ;;  %v983_v44 = vld [vmem:[#allocation8 + $0x164] ss:$16 sps:$4 sm:$0xff]   ;;  %v985_v45 = vld [vmem:[#allocation8 + $0x16c] ss:$16 sps:$4 sm:$0xff]   ;;  %v987_v47 = vld [vmem:[#allocation8 + $0x160] ss:$16 sps:$4 sm:$0xff]  }
  0x5a   :  { %v79_v46 = vld [vmem:[#allocation5] sm:$0xff]  ;;  %v988_v49 = vld [vmem:[#allocation8 + $0x168] ss:$16 sps:$4 sm:$0xff]   ;;  %v991_v51 = vld [vmem:[#allocation8 + $0x18c] ss:$16 sps:$4 sm:$0xff]   ;;  %v1201_v14 = vmov 0  }
  0x5b   :  { %v80_v48 = vpack.c.bf16 %v79_v46, %v79_v46  ;;  %v989_v50 = vld [vmem:[#allocation8 + $0x184] ss:$16 sps:$4 sm:$0xff]   ;;  %v993_v52 = vld [vmem:[#allocation8 + $0x180] ss:$16 sps:$4 sm:$0xff]   ;;  %v994_v53 = vld [vmem:[#allocation8 + $0x188] ss:$16 sps:$4 sm:$0xff]  }
  0x5c   :  { %598 = vmatpush1.bf16.msra.mxu0 %v945_v18  ;;  %680 = vmatpush1.bf16.msra.mxu1 %v946_v19  ;;  %v995_v54 = vld [vmem:[#allocation8 + $0x1a4] ss:$16 sps:$4 sm:$0xff]   ;;  %v997_v55 = vld [vmem:[#allocation8 + $0x1ac] ss:$16 sps:$4 sm:$0xff]   ;;  %v999_v56 = vld [vmem:[#allocation8 + $0x1a0] ss:$16 sps:$4 sm:$0xff]  }
  0x5d   :  { %599 = vmatprep.subr.bf16.mxu0 %v947_v20  ;;  %681 = vmatprep.subr.bf16.mxu1 %v949_v21  ;;  %v1000_v57 = vld [vmem:[#allocation8 + $0x1a8] ss:$16 sps:$4 sm:$0xff]   ;;  %v1001_v58 = vld [vmem:[#allocation8 + $0x1c4] ss:$16 sps:$4 sm:$0xff]   ;;  %v1003_v59 = vld [vmem:[#allocation8 + $0x1cc] ss:$16 sps:$4 sm:$0xff]  }
  0x5e   :  { %621 = vmatprep.mubr.bf16.mxu0 %v80_v48  ;;  %703 = vmatprep.mubr.bf16.mxu1 %v80_v48  ;;  %v1005_v60 = vld [vmem:[#allocation8 + $0x1c0] ss:$16 sps:$4 sm:$0xff]   ;;  %v1006_v61 = vld [vmem:[#allocation8 + $0x1c8] ss:$16 sps:$4 sm:$0xff]   ;;  %v1007_v62 = vld [vmem:[#allocation8 + $0x1e4] ss:$16 sps:$4 sm:$0xff]  }
  0x5f   :  { %v1009_v63 = vld [vmem:[#allocation8 + $0x1ec] ss:$16 sps:$4 sm:$0xff]   ;;  %v1011_v0 = vld [vmem:[#allocation8 + $0x1e0] ss:$16 sps:$4 sm:$0xff]   ;;  %v1012_v1 = vld [vmem:[#allocation8 + $0x1e8] ss:$16 sps:$4 sm:$0xff]  }
  0x60   :  { %600 = vmatpush1.bf16.msra.mxu0 %v951_v22  ;;  %682 = vmatpush1.bf16.msra.mxu1 %v952_v23  ;;  %v77_v2 = vld [vmem:[#allocation2] sm:$0xff]  ;;  %v1015_v3 = vld [vmem:[#allocation8 + $0x204] ss:$16 sps:$4 sm:$0xff]   ;;  %v1013_v6 = vld [vmem:[#allocation8 + $0x200] ss:$16 sps:$4 sm:$0xff]   ;;  %vm585_vm0 = vcmask 523264   ;;  %v165_v23 = vlaneseq }
  0x61   :  { %601 = vmatprep.subr.bf16.mxu0 %v953_v24  ;;  %683 = vmatprep.subr.bf16.mxu1 %v955_v25  ;;  %v1018_v4 = vld [vmem:[#allocation8 + $0x20c] ss:$16 sps:$4 sm:$0xff]   ;;  %v78_v5 = vpack.c.bf16 %v77_v2, %v77_v2  ;;  %v1016_v7 = vld [vmem:[#allocation8 + $0x208] ss:$16 sps:$4 sm:$0xff]   ;;  %v1021_v8 = vld [vmem:[#allocation8 + $0x224] ss:$16 sps:$4 sm:$0xff]  }
  0x62   :  { %v1024_v9 = vld [vmem:[#allocation8 + $0x22c] ss:$16 sps:$4 sm:$0xff]   ;;  %v1019_v10 = vld [vmem:[#allocation8 + $0x220] ss:$16 sps:$4 sm:$0xff]   ;;  %v1022_v11 = vld [vmem:[#allocation8 + $0x228] ss:$16 sps:$4 sm:$0xff]  }
  0x63   :  { %v1027_v12 = vld [vmem:[#allocation8 + $0x244] ss:$16 sps:$4 sm:$0xff]   ;;  %v1030_v13 = vld [vmem:[#allocation8 + $0x24c] ss:$16 sps:$4 sm:$0xff]   ;;  %v1025_v15 = vld [vmem:[#allocation8 + $0x240] ss:$16 sps:$4 sm:$0xff]  }
  0x64   :  { %602 = vmatpush1.bf16.msra.mxu0 %v957_v26  ;;  %684 = vmatpush1.bf16.msra.mxu1 %v958_v27  ;;  %v1028_v16 = vld [vmem:[#allocation8 + $0x248] ss:$16 sps:$4 sm:$0xff]   ;;  %v1033_v17 = vld [vmem:[#allocation8 + $0x264] ss:$16 sps:$4 sm:$0xff]   ;;  %v1036_v18 = vld [vmem:[#allocation8 + $0x26c] ss:$16 sps:$4 sm:$0xff]  }
  0x65   :  { %603 = vmatprep.subr.bf16.mxu0 %v959_v28  ;;  %685 = vmatprep.subr.bf16.mxu1 %v961_v29  ;;  %v1031_v19 = vld [vmem:[#allocation8 + $0x260] ss:$16 sps:$4 sm:$0xff]   ;;  %v1034_v20 = vld [vmem:[#allocation8 + $0x268] ss:$16 sps:$4 sm:$0xff]   ;;  %v166_v24 = vshrl.u32 %v165_v23, 7  ;;  %s1202_s26 = smov [#allocation11]  }
  0x66   :  { %v81_v21 = vld [vmem:[#allocation7] sm:$0xff]  ;;  %v163_v26 = vld [vmem:[%s1334_s5] sm:$0xf]  ;;  %s796_s28 = sshll.u32 %s1202_s26, 4  ;;  %s797_s28 = int_to_ptr.vmem [resolvable:$true] %s796_s28 }
  0x67   :  { %v82_v22 = vpack.c.bf16 %v81_v21, %v81_v21  ;;  %v167_v25 = vsub.s32 0, %v166_v24  ;;  %v171_v27 = vsub.s32 1, %v166_v24  ;;  %s1141_s29 = scalar_lea.vmem %s797_s28, 128  ;;  %p1146_p5 = scmp.lt.s32.totalorder %s797_s28, %s797_s28 }
  0x68   :  { %604 = vmatpush1.bf16.msra.mxu0 %v963_v30  ;;  %686 = vmatpush1.bf16.msra.mxu1 %v964_v31  ;;  %p1142_p4 = scmp.ne.s32.totalorder %s797_s28, %s1141_s29  ;;  %p1147_p6 = scmp.lt.s32.totalorder %s1141_s29, %s1141_s29 }
  0x69   :  { %605 = vmatprep.subr.bf16.mxu0 %v965_v32  ;;  %687 = vmatprep.subr.bf16.mxu1 %v967_v33  ;;  %v168_v28 = vrot.slane %v163_v26, %v167_v25  ;;  %v172_v29 = vrot.slane %v163_v26, %v171_v27  ;;  %v175_v33 = vsub.s32 2, %v166_v24 }
  0x6a   :  { %p1148_p7 = por %p1147_p6, %p1146_p5 }
  0x6c   :  { %606 = vmatpush1.bf16.msra.mxu0 %v969_v34  ;;  %688 = vmatpush1.bf16.msra.mxu1 %v970_v35  ;;  %p1149_p8 = pnand %p1148_p7, %p1142_p4 }
  0x6d   :  { %607 = vmatprep.subr.bf16.mxu0 %v971_v36  ;;  %689 = vmatprep.subr.bf16.mxu1 %v973_v37 }
  0x70   :  { %608 = vmatpush1.bf16.msra.mxu0 %v975_v38  ;;  %690 = vmatpush1.bf16.msra.mxu1 %v976_v39 }
  0x71   :  { %609 = vmatprep.subr.bf16.mxu0 %v977_v40  ;;  %691 = vmatprep.subr.bf16.mxu1 %v979_v41 }
  0x74   :  { %610 = vmatpush1.bf16.msra.mxu0 %v981_v42  ;;  %692 = vmatpush1.bf16.msra.mxu1 %v982_v43  ;;  %v179_v43 = vsub.s32 3, %v166_v24 }
  0x75   :  { %611 = vmatprep.subr.bf16.mxu0 %v983_v44  ;;  %693 = vmatprep.subr.bf16.mxu1 %v985_v45  ;;  %v176_v44 = vrot.slane %v163_v26, %v175_v33 }
  0x76   :  { %v180_v45 = vrot.slane %v163_v26, %v179_v43 }
  0x78   :  { %612 = vmatpush1.bf16.msra.mxu0 %v987_v47  ;;  %694 = vmatpush1.bf16.msra.mxu1 %v988_v49 }
  0x79   :  { %613 = vmatprep.subr.bf16.mxu0 %v989_v50  ;;  %695 = vmatprep.subr.bf16.mxu1 %v991_v51 }
  0x7c   :  { %614 = vmatpush1.bf16.msra.mxu0 %v993_v52  ;;  %696 = vmatpush1.bf16.msra.mxu1 %v994_v53 }
  0x7d   :  { %615 = vmatprep.subr.bf16.mxu0 %v995_v54  ;;  %697 = vmatprep.subr.bf16.mxu1 %v997_v55 }
  0x80   :  { %616 = vmatpush1.bf16.msra.mxu0 %v999_v56  ;;  %698 = vmatpush1.bf16.msra.mxu1 %v1000_v57  ;;  %v772_v56 = vld [vmem:[%s1332_s3] sm:$0xff] }
  0x81   :  { %617 = vmatprep.subr.bf16.mxu0 %v1001_v58  ;;  %699 = vmatprep.subr.bf16.mxu1 %v1003_v59 }
  0x84   :  { %618 = vmatpush1.bf16.msra.mxu0 %v1005_v60  ;;  %700 = vmatpush1.bf16.msra.mxu1 %v1006_v61 }
  0x85   :  { %619 = vmatprep.subr.bf16.mxu0 %v1007_v62  ;;  %701 = vmatprep.subr.bf16.mxu1 %v1009_v63 }
  0x88   :  { %620 = vmatpush1.bf16.msra.mxu0 %v1011_v0  ;;  %702 = vmatpush1.bf16.msra.mxu1 %v1012_v1 }
  0x89   :  { %630 = vmatprep.subr.bf16.mxu0 %v1015_v3  ;;  %712 = vmatprep.subr.bf16.mxu1 %v1018_v4 }
  0x8b   :  { %622 = vmatmul.mubr.bf16.vlgmr.msra.gmra.mrb[0].mxu0 %v78_v5  ;;  %704 = vmatmul.mubr.bf16.vlgmr.msra.gmra.mrb[0].mxu1 %v78_v5 }
  0x8c   :  { %631 = vmatpush1.bf16.msra.mxu0 %v1013_v6  ;;  %713 = vmatpush1.bf16.msra.mxu1 %v1016_v7 }
  0x8d   :  { %632 = vmatprep.subr.bf16.mxu0 %v1021_v8  ;;  %714 = vmatprep.subr.bf16.mxu1 %v1024_v9 }
  0x8e   :  { %662 = vmatprep.mubr.bf16.mxu0 %v1201_v14  ;;  %744 = vmatprep.mubr.bf16.mxu1 %v1201_v14 }
  0x90   :  { %633 = vmatpush1.bf16.msra.mxu0 %v1019_v10  ;;  %715 = vmatpush1.bf16.msra.mxu1 %v1022_v11 }
  0x91   :  { %634 = vmatprep.subr.bf16.mxu0 %v1027_v12  ;;  %716 = vmatprep.subr.bf16.mxu1 %v1030_v13 }
  0x94   :  { %635 = vmatpush1.bf16.msra.mxu0 %v1025_v15  ;;  %717 = vmatpush1.bf16.msra.mxu1 %v1028_v16 }
  0x95   :  { %636 = vmatprep.subr.bf16.mxu0 %v1033_v17  ;;  %718 = vmatprep.subr.bf16.mxu1 %v1036_v18 }
  0x98   :  { %637 = vmatpush1.bf16.msra.mxu0 %v1031_v19  ;;  %719 = vmatpush1.bf16.msra.mxu1 %v1034_v20 }
  0x9b   :  { %891 = vmatmul.mubr.msk.bf16.vlgmr.msra.gmra.mrb[0].mxu0 %vm585_vm0, %v82_v22  ;;  %892 = vmatmul.mubr.msk.bf16.vlgmr.msra.gmra.mrb[0].mxu1 %vm585_vm0, %v82_v22 }
 0x16e   :  { %v664_v30 = vpop.f32.mrb[0].mxu0  ;;  %v746_v31 = vpop.f32.mrb[0].mxu1 }
 0x16f   :  { %v896_v32 = vadd.f32 %v664_v30, %v168_v28  ;;  %v666_v34 = vpop.f32.mrb[1].mxu0  ;;  %v748_v35 = vpop.f32.mrb[1].mxu1  ;;  %v898_v46 = vadd.f32 %v746_v31, %v176_v44 }
 0x170   :  { %v897_v36 = vadd.f32 %v666_v34, %v172_v29  ;;  %v668_v37 = vpop.f32.mrb[2].mxu0  ;;  %v750_v38 = vpop.f32.mrb[2].mxu1  ;;  %v899_v47 = vadd.f32 %v748_v35, %v180_v45 }
 0x171   :  { %v893_v39 = vmul.f32 -1.442695, %v896_v32  ;;  %v669_v40 = vpop.f32.mrb[3].mxu0  ;;  %v751_v41 = vpop.f32.mrb[3].mxu1  ;;  %v895_v48 = vmul.f32 -1.442695, %v898_v46 }
 0x172   :  { %v894_v42 = vmul.f32 -1.442695, %v897_v36 }
 0x173   :  { %1037 = vpow2.f32 %v893_v39 }
 0x174   :  { %1039 = vpow2.f32 %v894_v42 }
 0x175   :  { %1041 = vtanh.f32 %v899_v47 }
 0x176   :  { %1043 = vpow2.f32 %v895_v48 }
 0x17d   :  { %v1038_v49 = vpop.eup %1037 }
 0x17e   :  { %v762_v50 = vadd.f32 1.0, %v1038_v49  ;;  %v1040_v51 = vpop.eup %1039 }
 0x17f   :  { %v763_v52 = vadd.f32 1.0, %v1040_v51  ;;  %v1042_v53 = vpop.eup %1041 }
 0x180   :  { %1045 = vrcp.f32 %v762_v50  ;;  %v1044_v54 = vpop.eup %1043 }
 0x181   :  { %1047 = vrcp.f32 %v763_v52  ;;  %v764_v59 = vadd.f32 1.0, %v1044_v54 }
 0x183   :  { %1049 = vrcp.f32 %v764_v59 }
 0x18a   :  { %v1046_v55 = vpop.eup %1045 }
 0x18b   :  { %v774_v57 = vmul.f32 %v1046_v55, %v1042_v53  ;;  %v1048_v58 = vpop.eup %1047 }
 0x18c   :  { %v773_v60 = vmul.f32 %v1048_v58, %v772_v56 }
 0x18e   :  { %v775_v61 = vadd.f32 %v774_v57, %v773_v60 }
 0x190   :  { %779 = vst [vmem:[#allocation11] sm:$0xff] %v775_v61  ;;  %1051 = vtanh.f32 %v775_v61 }
 0x191   :  { %1152 = shalt.err (!%p1149_p8)
}
 0x192   :  { %s1153_s8 = scalar_lea.hbm %s1336_s7, 128 }
 0x193   :  { %p1154_p9 = scmp.ne.s32.totalorder %s1336_s7, %s1153_s8  ;;  %p1157_p10 = scmp.lt.u32.totalorder %s1153_s8, %s1336_s7 }
 0x195   :  { %p1159_p11 = pnand %p1157_p10, %p1154_p9 }
 0x197   :  { %1162 = shalt.err (!%p1159_p11)
}
 0x198   :  { %799 = dma.vmem_to_hbm [thread:$0]  %s797_s28, 128, %s1336_s7, [#allocation12]   ;;  %v1050_v62 = vpop.eup %1049 }
 0x199   :  { %s1203_s13 = smov [#allocation10]  }
 0x19a   :  { %s786_s14 = sshll.u32 %s1203_s13, 4  ;;  %v1052_v63 = vpop.eup %1051  ;;  %s787_s14 = int_to_ptr.vmem [resolvable:$true] %s786_s14 }
 0x19b   :  { %v777_v0 = vmul.f32 %v1052_v63, %v1050_v62  ;;  %s1163_s15 = scalar_lea.vmem %s787_s14, 128  ;;  %p1168_p13 = scmp.lt.s32.totalorder %s787_s14, %s787_s14 }
 0x19c   :  { %p1164_p12 = scmp.ne.s32.totalorder %s787_s14, %s1163_s15  ;;  %p1169_p0 = scmp.lt.s32.totalorder %s1163_s15, %s1163_s15 }
 0x19d   :  { %778 = vst [vmem:[#allocation10] sm:$0xff] %v777_v0 }
 0x19e   :  { %p1170_p1 = por %p1169_p0, %p1168_p13 }
 0x1a0   :  { %p1171_p2 = pnand %p1170_p1, %p1164_p12 }
 0x1a2   :  { %1174 = shalt.err (!%p1171_p2)
}
 0x1a3   :  { %s1175_s18 = scalar_lea.hbm %s1335_s6, 128 }
 0x1a4   :  { %p1176_p3 = scmp.ne.s32.totalorder %s1335_s6, %s1175_s18  ;;  %p1179_p4 = scmp.lt.u32.totalorder %s1175_s18, %s1335_s6 }
 0x1a6   :  { %p1181_p5 = pnand %p1179_p4, %p1176_p3 }
 0x1a8   :  { %1184 = shalt.err (!%p1181_p5)
}
 0x1a9   :  { %789 = dma.vmem_to_hbm [thread:$0]  %s787_s14, 128, %s1335_s6, [#allocation4]  }
 0x1aa   :  { %1191 = dma.done.wait [#allocation4], 128  }
 0x1ab   :  { %1192 = vsyncadd [#allocation4], 4294967168 }
 0x1ac   :  { %1193 = dma.done.wait [#allocation12], 128  }
 0x1ad   :  { %1194 = vsyncadd [#allocation12], 4294967168 }
 0x1ae   :  { %806 = vsyncpa [#allocation3], 1 }
 0x1af   :  { %807 = vsyncpa [#allocation6], 1 }
 0x1b0   :  { %808 = vsyncpa [#allocation9], 1 }
 0x1b1   :  { %809 = vsyncpa [#allocation4], 1 }
 0x1b2   :  { %810 = vsyncpa [#allocation12], 1 }

</bundles_post_ra>
